<compile_context>
chip_gen: v5e
topology: v5e:2x2
jax: 0.10.0
libtpu: 0.0.40
codegen_flags: <defaults>
</compile_context>

<pallas_src>
import jax
import jax.numpy as jnp
from jax.experimental import pallas as pl
from jax.experimental.pallas import tpu as pltpu


_VPU_MAX_C = 8            # C <= 8: unrolled VPU FMAs; C > 8: MXU matmul
_STRIDE0_BCAST = None     # lazily-probed: stride-0 sublane-broadcast load support


# --------------------------------------------------------------------------- #
# Hardware / capability helpers
# --------------------------------------------------------------------------- #
def _vmem_capacity_bytes():
    """Physical VMEM per TensorCore; conservative (v7x) fallback if unknown."""
    try:
        return int(getattr(pltpu.get_tpu_info(), "vmem_capacity_bytes"))
    except Exception:
        return 64 << 20


def _vmem_limit_bytes(needed_bytes):
    """Scoped-VMEM limit: cover the working set with headroom, stay under every
    generation's physical ceiling (v7x = 64 MiB)."""
    return int(min(max(16 << 20, 2 * needed_bytes), 56 << 20))


def _bcast_load_supported():
    """Probe once whether `ref[pl.ds(k, n, stride=0), :]` (stride-0 sublane
    broadcast, served by the vld slot) lowers, runs and is correct on this
    backend.  Falls back to an implicit (XLU) broadcast otherwise."""
    global _STRIDE0_BCAST
    if _STRIDE0_BCAST is None:
        def probe(x_ref, o_ref):
            o_ref[...] = x_ref[pl.ds(1, 8, stride=0), :] * 2.0

        try:
            x = jnp.arange(4 * 128, dtype=jnp.float32).reshape(4, 128)
            out = pl.pallas_call(
                probe, out_shape=jax.ShapeDtypeStruct((8, 128), jnp.float32))(x)
            jax.block_until_ready(out)
            _STRIDE0_BCAST = bool(jnp.allclose(out[0], x[1] * 2.0)
                                  and jnp.allclose(out[7], x[1] * 2.0))
        except Exception:
            _STRIDE0_BCAST = False
    return _STRIDE0_BCAST


def _pick_hw_tile(hwp, c, oc, blocks_budget):
    """Largest multiple-of-128 tile dividing hwp whose double-buffered f32 input +
    output blocks plus the (OC, T) accumulator/temporaries fit `blocks_budget`."""
    bytes_per_col = 4 * (2 * c + 2 * oc + 2 * oc)     # dbuf x + dbuf out + acc/temps
    max_cols = max(128, (blocks_budget // bytes_per_col) // 128 * 128)
    if hwp <= max_cols:
        return hwp
    t = max_cols
    while t >= 128:
        if hwp % t == 0:
            return t
        t -= 128
    return 128                                        # hwp is a multiple of 128


# --------------------------------------------------------------------------- #
# Kernels
# --------------------------------------------------------------------------- #
def _make_fused_kernel(hw_true, use_bcast):
    """Single-pass SE: squeeze + excitation + reweight + 1x1 conv, x read once."""
    inv_hw = 1.0 / float(hw_true)

    def kernel(x_ref, w1_ref, w2t_ref, wct_ref, b_ref, o_ref):
        # x_ref  : (C, HWp)    o_ref : (OC, HWp)   (batch dim squeezed)
        # w1_ref : (C, Cr)     w2t_ref: (C, Cr)  (= W2^T)
        # wct_ref: (OC, C)     b_ref : (OC, 1)
        c, hwp = x_ref.shape
        oc = o_ref.shape[0]

        # --- squeeze: global average pool (padded lanes are zeros) ----------
        pooled = jnp.sum(x_ref[...].astype(jnp.float32), axis=1,
                         keepdims=True) * inv_hw                       # (C, 1)

        # --- excitation: tiny matmuls as broadcast-mul + axis reductions ----
        w1 = w1_ref[...].astype(jnp.float32)                           # (C, Cr)
        w2t = w2t_ref[...].astype(jnp.float32)                         # (C, Cr)
        hidden = jnp.maximum(
            jnp.sum(w1 * pooled, axis=0, keepdims=True), 0.0)          # (1, Cr)
        gate = jax.nn.sigmoid(
            jnp.sum(w2t * hidden, axis=1, keepdims=True))              # (C, 1)

        # --- reweight + 1x1 conv --------------------------------------------
        wct = wct_ref[...].astype(jnp.float32)                         # (OC, C)
        if c <= _VPU_MAX_C:
            out = jnp.zeros((oc, hwp), jnp.float32)
            for k in range(c):
                wk = wct[:, k:k + 1] * gate[k:k + 1, :]                # (OC, 1)
                if use_bcast:
                    xk = x_ref[pl.ds(k, oc, stride=0), :]              # (OC, HWp) vld bcast
                else:
                    xk = x_ref[k:k + 1, :]                             # (1, HWp)  XLU bcast
                out = out + wk * xk.astype(jnp.float32)
        else:
            xs = x_ref[...].astype(jnp.float32) * gate                 # (C, HWp)
            out = jnp.dot(wct, xs, preferred_element_type=jnp.float32)
        o_ref[...] = (out + b_ref[...].astype(jnp.float32)).astype(o_ref.dtype)

    return kernel


def _make_conv_kernel(use_bcast):
    """Tiled reweight+conv: gate already folded into the per-batch weight."""

    def kernel(x_ref, we_ref, b_ref, o_ref):
        # x_ref : (C, T)    we_ref: (OC, C)  (= Wc^T * gate[b])
        # b_ref : (OC, 1)   o_ref : (OC, T)
        c, t = x_ref.shape
        oc = o_ref.shape[0]
        we = we_ref[...].astype(jnp.float32)
        if c <= _VPU_MAX_C:
            out = jnp.zeros((oc, t), jnp.float32)
            for k in range(c):
                if use_bcast:
                    xk = x_ref[pl.ds(k, oc, stride=0), :]              # (OC, T) vld bcast
                else:
                    xk = x_ref[k:k + 1, :]                             # (1, T)   XLU bcast
                out = out + we[:, k:k + 1] * xk.astype(jnp.float32)
        else:
            out = jnp.dot(we, x_ref[...].astype(jnp.float32),
                          preferred_element_type=jnp.float32)
        o_ref[...] = (out + b_ref[...].astype(jnp.float32)).astype(o_ref.dtype)

    return kernel


# --------------------------------------------------------------------------- #
# Wrapper
# --------------------------------------------------------------------------- #
def se_forward(x_nchw, w1, w2, wc, bc, out_dtype=None, prefer_fused=True):
    """SE block forward. x_nchw: (B, C, H, W) -> (B, OC, H, W).

    out_dtype: set to jnp.bfloat16 to halve output HBM writeback when the
    consumer allows; default keeps the input dtype (module-exact)."""
    B, C, H, W = x_nchw.shape
    Cr = w1.shape[1]
    OC = wc.shape[1]
    HW = H * W
    out_dtype = x_nchw.dtype if out_dtype is None else out_dtype

    # NCHW -> (B, C, HW): free reshape (channels stay on sublanes, spatial goes
    # on the 128-wide lane axis).  Pad HW up to a lane multiple so every store
    # is an unmasked lane-dense vst and VMEM stays bounded.
    HWp = max(128, ((HW + 127) // 128) * 128)
    x3 = x_nchw.reshape(B, C, HW)
    if HWp != HW:
        x3 = jnp.pad(x3, ((0, 0), (0, 0), (0, HWp - HW)))

    vmem_cap = _vmem_capacity_bytes()
    use_bcast = _bcast_load_supported()

    wct = jnp.transpose(wc)                          # (OC, C): out = W @ x
    bc2 = bc.reshape(OC, 1).astype(jnp.float32)      # column -> broadcasts on lanes

    # Per-batch fused footprint: dbuf x block + dbuf out block + acc/temps (f32).
    fused_bytes = 4 * HWp * (3 * C + 4 * OC)
    fuse = prefer_fused and B >= 2 and fused_bytes <= vmem_cap // 3

    if fuse:
        # ---- fused single-pass kernel: x read from HBM exactly once --------
        out3 = pl.pallas_call(
            _make_fused_kernel(HW, use_bcast),
            out_shape=jax.ShapeDtypeStruct((B, OC, HWp), out_dtype),
            grid_spec=pltpu.PrefetchScalarGridSpec(
                num_scalar_prefetch=0,
                grid=(B,),
                in_specs=[
                    pl.BlockSpec((None, C, HWp), lambda b: (b, 0, 0)),
                    pl.BlockSpec((C, Cr), lambda b: (0, 0)),
                    pl.BlockSpec((C, Cr), lambda b: (0, 0)),
                    pl.BlockSpec((OC, C), lambda b: (0, 0)),
                    pl.BlockSpec((OC, 1), lambda b: (0, 0)),
                ],
                out_specs=pl.BlockSpec((None, OC, HWp), lambda b: (b, 0, 0)),
            ),
            compiler_params=pltpu.CompilerParams(
                dimension_semantics=("parallel",),
                vmem_limit_bytes=_vmem_limit_bytes(fused_bytes),
            ),
        )(x3, w1, jnp.transpose(w2), wct, bc2)
    else:
        # ---- split path: gate in XLA, folded into per-batch weights --------
        hp = jax.lax.Precision.HIGHEST
        pooled = jnp.sum(x3, axis=2) * (1.0 / HW)                     # (B, C)
        hidden = jnp.maximum(jnp.dot(pooled, w1, precision=hp), 0.0)  # (B, Cr)
        gate = jax.nn.sigmoid(jnp.dot(hidden, w2, precision=hp))      # (B, C)
        w_eff = (wct[None, :, :] * gate[:, None, :]).astype(jnp.float32)  # (B, OC, C)

        T = _pick_hw_tile(HWp, C, OC, blocks_budget=vmem_cap // 6)
        # v7x has 2 TensorCores: make sure the 'parallel' grid has >= 2 programs.
        if B * (HWp // T) < 2 and HWp >= 256:
            t_try = (HWp // 2) // 128 * 128
            while t_try >= 128:
                if HWp % t_try == 0:
                    T = t_try
                    break
                t_try -= 128
        grid = (B, HWp // T)
        needed = 4 * T * (2 * C + 4 * OC) + 4 * OC * C

        out3 = pl.pallas_call(
            _make_conv_kernel(use_bcast),
            out_shape=jax.ShapeDtypeStruct((B, OC, HWp), out_dtype),
            grid_spec=pltpu.PrefetchScalarGridSpec(
                num_scalar_prefetch=0,
                grid=grid,
                in_specs=[
                    pl.BlockSpec((None, C, T), lambda b, t: (b, 0, t)),
                    pl.BlockSpec((None, OC, C), lambda b, t: (b, 0, 0)),
                    pl.BlockSpec((OC, 1), lambda b, t: (0, 0)),
                ],
                out_specs=pl.BlockSpec((None, OC, T), lambda b, t: (b, 0, t)),
            ),
            compiler_params=pltpu.CompilerParams(
                dimension_semantics=("parallel", "parallel"),
                vmem_limit_bytes=_vmem_limit_bytes(needed),
            ),
        )(x3, w_eff, bc2)

    if HWp != HW:
        out3 = out3[:, :, :HW]
    return out3.reshape(B, OC, H, W)


# --------------------------------------------------------------------------- #
# Pure-JAX reference (f32 everywhere, HIGHEST matmul precision)
# --------------------------------------------------------------------------- #
def se_reference(x_nchw, w1, w2, wc, bc):
    hp = jax.lax.Precision.HIGHEST
    y = jnp.mean(x_nchw, axis=(2, 3))                                  # (B, C)
    y = jnp.maximum(jnp.dot(y, w1, precision=hp), 0.0)                 # (B, Cr)
    y = jax.nn.sigmoid(jnp.dot(y, w2, precision=hp))                   # (B, C)
    xs = x_nchw * y[:, :, None, None]
    out = jnp.einsum("bchw,co->bohw", xs, wc, precision=hp)
    return out + bc[None, :, None, None]


if __name__ == "__main__":
    # Shapes consistent with the module: channel=4, out_chan=8, reduction_ratio=2.
    B, C, H, W = 2, 4, 16, 16
    OC, Cr = 8, 2

    key = jax.random.PRNGKey(0)
    kx, k1, k2, kc, kb = jax.random.split(key, 5)

    x = jax.random.normal(kx, (B, C, H, W), dtype=jnp.float32)
    w1 = jax.random.normal(k1, (C, Cr), dtype=jnp.float32) * 0.5   # Linear1 (in, out)
    w2 = jax.random.normal(k2, (Cr, C), dtype=jnp.float32) * 0.5   # Linear2 (in, out)
    wc = jax.random.normal(kc, (C, OC), dtype=jnp.float32) * 0.5   # 1x1 conv (C, OC)
    bc = jax.random.normal(kb, (OC,), dtype=jnp.float32) * 0.1

    ref = se_reference(x, w1, w2, wc, bc)

    # Fused single-pass path (x read from HBM once).
    out_fused = se_forward(x, w1, w2, wc, bc)
    jax.block_until_ready(out_fused)
    assert out_fused.shape == (B, OC, H, W), out_fused.shape
    assert jnp.allclose(out_fused, ref, atol=1e-4, rtol=1e-4), (
        float(jnp.max(jnp.abs(out_fused - ref))))

    # Split path (gate folded into per-batch weights, HW tiled).
    out_split = se_forward(x, w1, w2, wc, bc, prefer_fused=False)
    jax.block_until_ready(out_split)
    assert jnp.allclose(out_split, ref, atol=1e-4, rtol=1e-4), (
        float(jnp.max(jnp.abs(out_split - ref))))

    # Non-128-aligned spatial size exercises the lane-padding path.
    x2 = jax.random.normal(kx, (B, C, 10, 10), dtype=jnp.float32)
    ref2 = se_reference(x2, w1, w2, wc, bc)
    out2 = se_forward(x2, w1, w2, wc, bc)
    jax.block_until_ready(out2)
    assert jnp.allclose(out2, ref2, atol=1e-4, rtol=1e-4), (
        float(jnp.max(jnp.abs(out2 - ref2))))

    print("KERNEL_OK")
</pallas_src>

<mosaic_0001>
module attributes {stable_mosaic.version = 11 : i64} {
  func.func @probe(%arg0: memref<4x128xf32, #tpu.memory_space<vmem>>, %arg1: memref<8x128xf32, #tpu.memory_space<vmem>>) attributes {dimension_semantics = [], scalar_prefetch = 0 : i64, scratch_operands = 0 : i64, tpu.core_type = #tpu.core_type<tc>} {
    %c1 = arith.constant 1 : index
    %c0 = arith.constant 0 : index
    %0 = tpu.strided_load %arg0[%c1, %c0] {strides = array<i32: 0, 1>} : memref<4x128xf32, #tpu.memory_space<vmem>>, vector<8x128xf32>
    %cst = arith.constant 2.000000e+00 : f32
    %1 = vector.broadcast %cst : f32 to vector<8x128xf32>
    %2 = arith.mulf %0, %1 : vector<8x128xf32>
    %c0_0 = arith.constant 0 : index
    %c0_1 = arith.constant 0 : index
    %3 = vector.load %arg1[%c0_0, %c0_1] : memref<8x128xf32, #tpu.memory_space<vmem>>, vector<8x128xf32>
    tpu.vector_store %arg1[%c0_0, %c0_1], %2 {strides = array<i32>} : memref<8x128xf32, #tpu.memory_space<vmem>>, vector<8x128xf32>,
    return
  }
}

module attributes {stable_mosaic.version = 11 : i64} {
  func.func @kernel(%arg0: i32, %arg1: memref<1x4x256xf32, #tpu.memory_space<vmem>>, %arg2: memref<4x2xf32, #tpu.memory_space<vmem>>, %arg3: memref<4x2xf32, #tpu.memory_space<vmem>>, %arg4: memref<8x4xf32, #tpu.memory_space<vmem>>, %arg5: memref<8x1xf32, #tpu.memory_space<vmem>>, %arg6: memref<1x8x256xf32, #tpu.memory_space<vmem>>) attributes {dimension_semantics = [#tpu.dimension_semantics<parallel>], iteration_bounds = array<i64: 2>, scalar_prefetch = 0 : i64, scratch_operands = 0 : i64, tpu.core_type = #tpu.core_type<tc>, window_params = [{transform_indices = @transform_0, window_bounds = array<i64: 1, 4, 256>}, {pipeline_mode = #tpu.pipeline_mode<synchronous>, transform_indices = @transform_1, window_bounds = array<i64: 4, 2>}, {pipeline_mode = #tpu.pipeline_mode<synchronous>, transform_indices = @transform_2, window_bounds = array<i64: 4, 2>}, {pipeline_mode = #tpu.pipeline_mode<synchronous>, transform_indices = @transform_3, window_bounds = array<i64: 8, 4>}, {pipeline_mode = #tpu.pipeline_mode<synchronous>, transform_indices = @transform_4, window_bounds = array<i64: 8, 1>}, {transform_indices = @transform_5, window_bounds = array<i64: 1, 8, 256>}]} {
    %c0 = arith.constant 0 : index
    %c0_0 = arith.constant 0 : index
    %c0_1 = arith.constant 0 : index
    %0 = vector.load %arg1[%c0, %c0_0, %c0_1] : memref<1x4x256xf32, #tpu.memory_space<vmem>>, vector<1x4x256xf32>
    %1 = vector.shape_cast %0 : vector<1x4x256xf32> to vector<4x256xf32>
    %cst = arith.constant dense<0.000000e+00> : vector<4xf32>
    %2 = vector.multi_reduction <add>, %1, %cst [1] : vector<4x256xf32> to vector<4xf32>
    %3 = vector.shape_cast %2 : vector<4xf32> to vector<4x1xf32>
    %cst_2 = arith.constant 3.906250e-03 : f32
    %4 = vector.broadcast %cst_2 : f32 to vector<4x1xf32>
    %5 = arith.mulf %3, %4 : vector<4x1xf32>
    %c0_3 = arith.constant 0 : index
    %c0_4 = arith.constant 0 : index
    %6 = vector.load %arg2[%c0_3, %c0_4] : memref<4x2xf32, #tpu.memory_space<vmem>>, vector<4x2xf32>
    %c0_5 = arith.constant 0 : index
    %c0_6 = arith.constant 0 : index
    %7 = vector.load %arg3[%c0_5, %c0_6] : memref<4x2xf32, #tpu.memory_space<vmem>>, vector<4x2xf32>
    %8 = vector.broadcast %5 : vector<4x1xf32> to vector<4x2xf32>
    %9 = arith.mulf %6, %8 : vector<4x2xf32>
    %cst_7 = arith.constant dense<0.000000e+00> : vector<2xf32>
    %10 = vector.multi_reduction <add>, %9, %cst_7 [0] : vector<4x2xf32> to vector<2xf32>
    %11 = vector.shape_cast %10 : vector<2xf32> to vector<1x2xf32>
    %cst_8 = arith.constant 0.000000e+00 : f32
    %12 = vector.broadcast %cst_8 : f32 to vector<1x2xf32>
    %13 = arith.maximumf %11, %12 : vector<1x2xf32>
    %14 = vector.broadcast %13 : vector<1x2xf32> to vector<4x2xf32>
    %15 = arith.mulf %7, %14 : vector<4x2xf32>
    %cst_9 = arith.constant dense<0.000000e+00> : vector<4xf32>
    %16 = vector.multi_reduction <add>, %15, %cst_9 [1] : vector<4x2xf32> to vector<4xf32>
    %17 = vector.shape_cast %16 : vector<4xf32> to vector<4x1xf32>
    %18 = arith.negf %17 : vector<4x1xf32>
    %19 = math.exp %18 : vector<4x1xf32>
    %cst_10 = arith.constant 1.000000e+00 : f32
    %20 = vector.broadcast %cst_10 : f32 to vector<4x1xf32>
    %21 = arith.addf %20, %19 : vector<4x1xf32>
    %22 = arith.divf %20, %21 : vector<4x1xf32>
    %c0_11 = arith.constant 0 : index
    %c0_12 = arith.constant 0 : index
    %23 = vector.load %arg4[%c0_11, %c0_12] : memref<8x4xf32, #tpu.memory_space<vmem>>, vector<8x4xf32>
    %cst_13 = arith.constant 0.000000e+00 : f32
    %24 = vector.broadcast %cst_13 : f32 to vector<8x256xf32>
    %25 = vector.extract_strided_slice %23 {offsets = [0, 0], sizes = [8, 1], strides = [1, 1]} : vector<8x4xf32> to vector<8x1xf32>
    %26 = vector.extract_strided_slice %22 {offsets = [0, 0], sizes = [1, 1], strides = [1, 1]} : vector<4x1xf32> to vector<1x1xf32>
    %27 = vector.broadcast %26 : vector<1x1xf32> to vector<8x1xf32>
    %28 = arith.mulf %25, %27 : vector<8x1xf32>
    %c0_14 = arith.constant 0 : index
    %c0_15 = arith.constant 0 : index
    %c0_16 = arith.constant 0 : index
    %29 = vector.load %arg1[%c0_14, %c0_15, %c0_16] : memref<1x4x256xf32, #tpu.memory_space<vmem>>, vector<1x1x256xf32>
    %30 = vector.shape_cast %29 : vector<1x1x256xf32> to vector<1x256xf32>
    %31 = vector.broadcast %28 : vector<8x1xf32> to vector<8x256xf32>
    %32 = vector.broadcast %30 : vector<1x256xf32> to vector<8x256xf32>
    %33 = arith.mulf %31, %32 : vector<8x256xf32>
    %34 = arith.addf %24, %33 : vector<8x256xf32>
    %35 = vector.extract_strided_slice %23 {offsets = [0, 1], sizes = [8, 1], strides = [1, 1]} : vector<8x4xf32> to vector<8x1xf32>
    %36 = vector.extract_strided_slice %22 {offsets = [1, 0], sizes = [1, 1], strides = [1, 1]} : vector<4x1xf32> to vector<1x1xf32>
    %37 = vector.broadcast %36 : vector<1x1xf32> to vector<8x1xf32>
    %38 = arith.mulf %35, %37 : vector<8x1xf32>
    %c0_17 = arith.constant 0 : index
    %c1 = arith.constant 1 : index
    %c0_18 = arith.constant 0 : index
    %39 = vector.load %arg1[%c0_17, %c1, %c0_18] : memref<1x4x256xf32, #tpu.memory_space<vmem>>, vector<1x1x256xf32>
    %40 = vector.shape_cast %39 : vector<1x1x256xf32> to vector<1x256xf32>
    %41 = vector.broadcast %38 : vector<8x1xf32> to vector<8x256xf32>
    %42 = vector.broadcast %40 : vector<1x256xf32> to vector<8x256xf32>
    %43 = arith.mulf %41, %42 : vector<8x256xf32>
    %44 = arith.addf %34, %43 : vector<8x256xf32>
    %45 = vector.extract_strided_slice %23 {offsets = [0, 2], sizes = [8, 1], strides = [1, 1]} : vector<8x4xf32> to vector<8x1xf32>
    %46 = vector.extract_strided_slice %22 {offsets = [2, 0], sizes = [1, 1], strides = [1, 1]} : vector<4x1xf32> to vector<1x1xf32>
    %47 = vector.broadcast %46 : vector<1x1xf32> to vector<8x1xf32>
    %48 = arith.mulf %45, %47 : vector<8x1xf32>
    %c0_19 = arith.constant 0 : index
    %c2 = arith.constant 2 : index
    %c0_20 = arith.constant 0 : index
    %49 = vector.load %arg1[%c0_19, %c2, %c0_20] : memref<1x4x256xf32, #tpu.memory_space<vmem>>, vector<1x1x256xf32>
    %50 = vector.shape_cast %49 : vector<1x1x256xf32> to vector<1x256xf32>
    %51 = vector.broadcast %48 : vector<8x1xf32> to vector<8x256xf32>
    %52 = vector.broadcast %50 : vector<1x256xf32> to vector<8x256xf32>
    %53 = arith.mulf %51, %52 : vector<8x256xf32>
    %54 = arith.addf %44, %53 : vector<8x256xf32>
    %55 = vector.extract_strided_slice %23 {offsets = [0, 3], sizes = [8, 1], strides = [1, 1]} : vector<8x4xf32> to vector<8x1xf32>
    %56 = vector.extract_strided_slice %22 {offsets = [3, 0], sizes = [1, 1], strides = [1, 1]} : vector<4x1xf32> to vector<1x1xf32>
    %57 = vector.broadcast %56 : vector<1x1xf32> to vector<8x1xf32>
    %58 = arith.mulf %55, %57 : vector<8x1xf32>
    %c0_21 = arith.constant 0 : index
    %c3 = arith.constant 3 : index
    %c0_22 = arith.constant 0 : index
    %59 = vector.load %arg1[%c0_21, %c3, %c0_22] : memref<1x4x256xf32, #tpu.memory_space<vmem>>, vector<1x1x256xf32>
    %60 = vector.shape_cast %59 : vector<1x1x256xf32> to vector<1x256xf32>
    %61 = vector.broadcast %58 : vector<8x1xf32> to vector<8x256xf32>
    %62 = vector.broadcast %60 : vector<1x256xf32> to vector<8x256xf32>
    %63 = arith.mulf %61, %62 : vector<8x256xf32>
    %64 = arith.addf %54, %63 : vector<8x256xf32>
    %c0_23 = arith.constant 0 : index
    %c0_24 = arith.constant 0 : index
    %65 = vector.load %arg5[%c0_23, %c0_24] : memref<8x1xf32, #tpu.memory_space<vmem>>, vector<8x1xf32>
    %66 = vector.broadcast %65 : vector<8x1xf32> to vector<8x256xf32>
    %67 = arith.addf %64, %66 : vector<8x256xf32>
    %c0_25 = arith.constant 0 : index
    %c0_26 = arith.constant 0 : index
    %c0_27 = arith.constant 0 : index
    %68 = vector.load %arg6[%c0_25, %c0_26, %c0_27] : memref<1x8x256xf32, #tpu.memory_space<vmem>>, vector<1x8x256xf32>
    %69 = vector.shape_cast %68 : vector<1x8x256xf32> to vector<8x256xf32>
    %70 = vector.shape_cast %67 : vector<8x256xf32> to vector<1x8x256xf32>
    tpu.vector_store %arg6[%c0_25, %c0_26, %c0_27], %70 {strides = array<i32>} : memref<1x8x256xf32, #tpu.memory_space<vmem>>, vector<1x8x256xf32>,
    return
  }
  func.func @transform_0(%arg0: i32) -> (i32, i32, i32) {
    %c0_i32 = arith.constant 0 : i32
    %c0_i32_0 = arith.constant 0 : i32
    %c0_i32_1 = arith.constant 0 : i32
    return %arg0, %c0_i32, %c0_i32_0 : i32, i32, i32
  }
  func.func @transform_1(%arg0: i32) -> (i32, i32) {
    %c0_i32 = arith.constant 0 : i32
    %c0_i32_0 = arith.constant 0 : i32
    %c0_i32_1 = arith.constant 0 : i32
    return %c0_i32, %c0_i32_0 : i32, i32
  }
  func.func @transform_2(%arg0: i32) -> (i32, i32) {
    %c0_i32 = arith.constant 0 : i32
    %c0_i32_0 = arith.constant 0 : i32
    %c0_i32_1 = arith.constant 0 : i32
    return %c0_i32, %c0_i32_0 : i32, i32
  }
  func.func @transform_3(%arg0: i32) -> (i32, i32) {
    %c0_i32 = arith.constant 0 : i32
    %c0_i32_0 = arith.constant 0 : i32
    %c0_i32_1 = arith.constant 0 : i32
    return %c0_i32, %c0_i32_0 : i32, i32
  }
  func.func @transform_4(%arg0: i32) -> (i32, i32) {
    %c0_i32 = arith.constant 0 : i32
    %c0_i32_0 = arith.constant 0 : i32
    %c0_i32_1 = arith.constant 0 : i32
    return %c0_i32, %c0_i32_0 : i32, i32
  }
  func.func @transform_5(%arg0: i32) -> (i32, i32, i32) {
    %c0_i32 = arith.constant 0 : i32
    %c0_i32_0 = arith.constant 0 : i32
    %c0_i32_1 = arith.constant 0 : i32
    return %arg0, %c0_i32, %c0_i32_0 : i32, i32, i32
  }
}

</mosaic_0001>

<bundles_post_ra>
// kernel: tpu_custom_call.1
= control target key start
LH: loop header
LB: loop body
LE: loop exit
PB: predicated region body
PF: predicated region fallthrough
CT: control target
= control target key end

     0   :  { %6 = vsyncpa [#allocation3], 0  ;;  %s115_s0 = inlined_call_operand.hbm [shape: f32[4,128], index: 0, kind: input, shape index: {}]   ;;  %s116_s1 = inlined_call_operand.hbm [shape: f32[8,128], index: 1, kind: output, shape index: {}]  }
   0x1   :  { %7 = vsyncpa [#allocation4], 0  ;;  %s13_s8 = sshll.u32 %s115_s0, 4  ;;  %s97_s9 = smov [#allocation2]   ;;  %s14_s8 = int_to_ptr.hbm [resolvable:$true] %s13_s8 }
   0x2   :  { %s15_s10 = sshll.u32 %s97_s9, 4  ;;  %s16_s10 = int_to_ptr.vmem [resolvable:$true] %s15_s10 }
   0x3   :  { %18 = dma.hbm_to_vmem [thread:$0]  %s14_s8, 64, %s16_s10, [#allocation3]  }
   0x4   :  { %93 = dma.done.wait [#allocation3], 64  }
   0x5   :  { %94 = vsyncadd [#allocation3], 4294967232  ;;  %s98_s11 = smov [#allocation5]   ;;  %s33_s15 = sshll.u32 %s116_s1, 4  ;;  %v23_v0 = vld [vmem:[#allocation2 + $0x1] ss:$0 sm:$0xff]  ;;  %s34_s15 = int_to_ptr.hbm [resolvable:$true] %s33_s15 }
   0x6   :  { %s31_s12 = sshll.u32 %s98_s11, 4  ;;  %v24_v1 = vmul.f32 2.0, %v23_v0  ;;  %s32_s12 = int_to_ptr.vmem [resolvable:$true] %s31_s12 }
   0x8   :  { %25 = vst [vmem:[#allocation5] sm:$0xff] %v24_v1 }
   0x9   :  { %36 = dma.vmem_to_hbm [thread:$0]  %s32_s12, 128, %s34_s15, [#allocation4]  }
   0xa   :  { %95 = dma.done.wait [#allocation4], 128  }
   0xb   :  { %96 = vsyncadd [#allocation4], 4294967168 }
   0xc   :  { %41 = vsyncpa [#allocation3], 1 }
   0xd   :  { %42 = vsyncpa [#allocation4], 1 }

// kernel: tpu_custom_call.1
= control target key start
LH: loop header
LB: loop body
LE: loop exit
PB: predicated region body
PF: predicated region fallthrough
CT: control target
= control target key end

     0   :  { %10 = vsyncpa [#allocation3], 0  ;;  %s706_s0 = inlined_call_operand.vmem [shape: f32[2,4,256], index: 0, kind: input, shape index: {}]   ;;  %s707_s1 = inlined_call_operand.vmem [shape: f32[4,2], index: 1, kind: input, shape index: {}]   ;;  %s708_s2 = inlined_call_operand.vmem [shape: f32[4,2], index: 2, kind: input, shape index: {}]   ;;  %s709_s3 = inlined_call_operand.vmem [shape: f32[8,4], index: 3, kind: input, shape index: {}]   ;;  %s710_s4 = inlined_call_operand.vmem [shape: f32[8,1], index: 4, kind: input, shape index: {}]   ;;  %s711_s5 = inlined_call_operand.hbm [shape: f32[2,8,256], index: 5, kind: output, shape index: {}]  }
   0x1   :  { %12 = vsyncpa [#allocation3 + $0x1], 0  ;;  %s598_s18 = smov 0   ;;  %s600_s19 = smov 0  }
   0x2   :  { %s602_s20 = smov 0   ;;  %s604_s21 = smov 0  }
   0x3 LB: > { %s619_s22 = sadd.s32 4294967295, %s562_s21   ;;  %s430_s23 = sadd.s32 4294967294, %s562_s21   ;;  %s562_s21 = sphi %s604_s21, %s717_s21   ;;  %s558_s20 = sphi %s602_s20, %s716_s20   ;;  %s554_s19 = sphi %s600_s19, %s715_s19   ;;  %s550_s18 = sphi %s598_s18, %s714_s18  }
   0x4   : > { %s623_s24 = sadd.s32 1, %s562_s21   ;;  %s135_s25 = sadd.s32 1, %s558_s20 }
   0x5   : > { %s132_s26 = ssub.s32 %s562_s21, %s623_s24  ;;  %p145_p0 = scmp.ne.s32.totalorder %s558_s20, %s554_s19 }
   0x6   : > { %p133_p1 = scmp.eq.s32.totalorder %s132_s26, 0  ;;  %p146_p2 = scmp.eq.s32.totalorder %s619_s22, 1 }
   0x7   : > { %p151_p3 = scmp.ne.s32.totalorder %s554_s19, %s550_s18  ;;  %p152_p4 = scmp.eq.s32.totalorder %s430_s23, 1 }
   0x8   : > { %s634_s27 = scalar_select %p133_p1, %s558_s20, %s135_s25  }
   0x9   : > { %p636_p5 = por %p146_p2, %p145_p0  ;;  %p640_p6 = por %p152_p4, %p151_p3 }
   0xa   : > { %p433_p7 = scmp.ge.s32.totalorder %s562_s21, 1  ;;  %p190_p8 = scmp.lt.s32.totalorder %s562_s21, 3 }
   0xc   : > { %p191_p9 = pnand %p433_p7, %p190_p8 }
   0xd   : > { %p218_p10 = scmp.lt.s32.totalorder (!%p191_p9), %s619_s22, 1  ;;  %s215_s23 = sand.u32 (!%p191_p9), 1, %s554_s19  }
   0xe   : > { %194 = sbr.rel (%p191_p9) target bundleno = 459 (0x1cb), region = 40  ;;  %s434_s25 = sshll.u32 (!%p191_p9), %s215_s23, 4 }
   0xf   : > { %s447_s26 = sshll.u32 (!%p191_p9), %s619_s22, 4  ;;  %s217_s8 = scalar_lea.vmem (!%p191_p9), [#allocation2], %s434_s25 }
  0x10   : > { %s366_s7 = scalar_lea.hbm (!%p191_p9), %s711_s5, %s447_s26  ;;  %s355_s10 = scalar_lea.sflag (!%p191_p9), [#allocation3], %s215_s23 }
  0x11   : > { %s520_s15 = scalar_lea.hbm (!%p191_p9), %s711_s5, 32 }
  0x13   : > { %s219_s30 = scalar_select %p218_p10, %s619_s22, 1  ;;  %vm230_vm0 = vcmask 1043456   ;;  %v237_v6 = vld [vmem:[%s707_s1] sm:$0xf]  ;;  %vm240_vm1 = vcmask 11264   ;;  %v564_v21 = vmov 2  }
  0x14   : > { %v238_v17 = vld [vmem:[%s708_s2] sm:$0xf]  ;;  %493 = vset.pattern.permute.xlu2 %v564_v21  ;;  %v565_v22 = vmov 0   ;;  %v566_v47 = vmov 3   ;;  %v567_v48 = vmov 1   ;;  %s368_s22 = sshll.u32 %s217_s8, 4  ;;  %s369_s22 = int_to_ptr.vmem [resolvable:$true] %s368_s22 }
  0x15   : > { %s446_s6 = sshll.u32 %s219_s30, 3  ;;  %491 = vset.pattern.permute.xlu1 %v565_v22  ;;  %495 = vset.pattern.permute.xlu0 %v565_v22  ;;  %v344_v27 = vld [vmem:[%s710_s4] sm:$0xff] }
  0x16   : > { %s651_s9 = scalar_lea.vmem %s706_s0, %s446_s6  ;;  %v272_v38 = vld [vmem:[%s709_s3] sm:$0xff] }
  0x17   : > { %v223_v0 = vld [vmem:[%s651_s9] sm:$0xff] }
  0x18   : > { %225 = vst [vmem:[#allocation1] ss:$2 sm:$0xff] %v223_v0  ;;  %v275_v51 = vld [vmem:[%s651_s9] ss:$4 sm:$0x3] }
  0x19   : > { %v438_v52 = vld [vmem:[%s651_s9 + $0x1] ss:$4 sm:$0x3]  ;;  %v439_v53 = vld [vmem:[%s651_s9 + $0x2] ss:$4 sm:$0x3] }
  0x1a   : > { %v440_v54 = vld [vmem:[%s651_s9 + $0x3] ss:$4 sm:$0x3]  ;;  %v282_v55 = vperm.slane %v275_v51, 0  ;;  %v283_v56 = vperm.slane %v275_v51, 1  ;;  %v300_v57 = vperm.slane %v438_v52, 0 }
  0x1b   : > { %v301_v58 = vperm.slane %v438_v52, 1  ;;  %v318_v59 = vperm.slane %v439_v53, 0  ;;  %v319_v60 = vperm.slane %v439_v53, 1  ;;  %v336_v61 = vperm.slane %v440_v54, 0  ;;  %s370_s9 = sshll.u32 %s366_s7, 4  ;;  %s371_s9 = int_to_ptr.hbm [resolvable:$true] %s370_s9 }
  0x1c   : > { %v337_v62 = vperm.slane %v440_v54, 1  ;;  %s514_s11 = sshra.s32 %s371_s9, 4  ;;  %s515_s11 = int_to_ptr.hbm [resolvable:$true] %s514_s11 }
  0x1d   : > { %s516_s12 = scalar_lea.hbm %s515_s11, 16  ;;  %p521_p0 = scmp.lt.s32.totalorder %s515_s11, %s711_s5 }
  0x1e   : > { %p517_p11 = scmp.ne.s32.totalorder %s515_s11, %s516_s12  ;;  %p522_p1 = scmp.lt.s32.totalorder %s520_s15, %s516_s12 }
  0x1f   : > { %v226_v1 = vld.sshfl [vmem:[#allocation1] sm:$0xff pattern:$0x75316420]  ;;  %v227_v2 = vld.sshfl [vmem:[#allocation1 + $0x8] sm:$0xff pattern:$0x75316420] }
  0x20   : > { %v231_v3 = vsel %vm230_vm0, %v226_v1, 0.0  ;;  %v232_v4 = vsel %vm230_vm0, %v227_v2, 0.0  ;;  %p518_p12 = pnand %p517_p11, %p636_p5  ;;  %p523_p2 = por %p522_p1, %p521_p0 }
  0x21   : > { %v233_v5 = vadd.f32 %v232_v4, %v231_v3 }
  0x22   : > { %p519_p13 = pneg %p518_p12 }
  0x23   : > { %234 = vadd.xlane.f32.xlu0 %v233_v5 }
  0x24   : > { %p524_p3 = pnand %p523_p2, %p519_p13 }
  0x96   : > { %v235_v7 = vpop.xlane.xlu0 %234 }
  0x97   : > { %v236_v8 = vmul.f32 0.00390625, %v235_v7 }
  0x99   : > { %v239_v9 = vmul.f32 %v237_v6, %v236_v8 }
  0x9b   : > { %v241_v10 = vsel %vm240_vm1, %v239_v9, 0.0 }
  0x9c   : > { %v242_v11 = vrot.slane %v241_v10, 4 }
  0x9e   : > { %v243_v12 = vadd.f32 %v242_v11, %v241_v10 }
  0xa0   : > { %v244_v13 = vrot.slane %v243_v12, 2 }
  0xa2   : > { %v245_v14 = vadd.f32 %v244_v13, %v243_v12 }
  0xa4   : > { %v246_v15 = vrot.slane %v245_v14, 1 }
  0xa6   : > { %v247_v16 = vadd.f32 %v246_v15, %v245_v14 }
  0xa8   : > { %v248_v18 = vmax.f32 %v247_v16, 0.0 }
  0xaa   : > { %v249_v19 = vmul.f32 %v248_v18, %v238_v17 }
  0xac   : > { %v250_v20 = vsel %vm240_vm1, %v249_v19, 0.0 }
  0xad   : > { %251 = vadd.xlane.f32.xlu0 %v250_v20 }
  0xc1   : > { %347 = vperm.xlu0 %495, %v344_v27  }
 0x120   : > { %v252_v23 = vpop.xlane.xlu0 %251 }
 0x121   : > { %v437_v24 = vmul.f32 -1.442695, %v252_v23 }
 0x123   : > { %496 = vpow2.f32 %v437_v24 }
 0x129   : > { %v497_v25 = vpop.eup %496 }
 0x12a   : > { %v256_v26 = vadd.f32 1.0, %v497_v25 }
 0x12c   : > { %498 = vrcp.f32 %v256_v26  ;;  %v268_v31 = vand.u32 2147483648, %v256_v26  ;;  %v266_v33 = vand.u32 2147483647, %v256_v26  ;;  %vm262_vm3 = vweird.f32 %v256_v26 }
 0x12e   : > { %v269_v35 = vor.u32 1.1754944e-38, %v268_v31  ;;  %vm267_vm5 = vcmp.eq.f32.partialorder %v266_v33, 8.507059e+37 }
 0x132   : > { %v499_v28 = vpop.eup %498 }
 0x133   : > { %v258_v29 = vmul.f32 %v499_v28, %v256_v26  ;;  %vm263_vm2 = vweird.f32 %v499_v28  ;;  %v348_v13 = vpop.permute.xlu0 %347 }
 0x134   : > { %vm264_vm4 = vmor %vm262_vm3, %vm263_vm2 }
 0x135   : > { %v259_v30 = vsub.f32 1.0, %v258_v29 }
 0x137   : > { %v260_v32 = vmul.f32 %v499_v28, %v259_v30 }
 0x139   : > { %v261_v34 = vadd.f32 %v499_v28, %v260_v32 }
 0x13b   : > { %v265_v36 = vsel %vm264_vm4, %v499_v28, %v261_v34 }
 0x13c   : > { %v270_v37 = vsel %vm267_vm5, %v269_v35, %v265_v36 }
 0x13d   : > { %v308_v39 = vperm.slane %v270_v37, 2  ;;  %v273_v40 = vperm.slane %v270_v37, 0  ;;  %v326_v43 = vperm.slane %v270_v37, 3  ;;  %v290_v44 = vperm.slane %v270_v37, 1 }
 0x13f   : > { %v309_v41 = vmul.f32 %v308_v39, %v272_v38  ;;  %v274_v42 = vmul.f32 %v273_v40, %v272_v38  ;;  %v327_v45 = vmul.f32 %v326_v43, %v272_v38  ;;  %v291_v46 = vmul.f32 %v290_v44, %v272_v38 }
 0x141   : > { %314 = vperm.xlu2 %493, %v309_v41   ;;  %278 = vperm.xlu1 %491, %v274_v42  }
 0x149   : > { %494 = vset.pattern.permute.xlu2 %v566_v47  ;;  %492 = vset.pattern.permute.xlu1 %v567_v48 }
 0x14a   : > { %332 = vperm.xlu2 %494, %v327_v45   ;;  %296 = vperm.xlu1 %492, %v291_v46  }
 0x19b   : > { %v315_v50 = vpop.permute.xlu2 %314 }
 0x19c   : > { %v322_v5 = vmul.f32 %v318_v59, %v315_v50  ;;  %v323_v6 = vmul.f32 %v319_v60, %v315_v50 }
 0x1a4   : > { %v333_v4 = vpop.permute.xlu2 %332 }
 0x1a5   : > { %v340_v9 = vmul.f32 %v336_v61, %v333_v4  ;;  %v341_v10 = vmul.f32 %v337_v62, %v333_v4 }
 0x1b3   : > { %v279_v49 = vpop.permute.xlu1 %278 }
 0x1b4   : > { %v286_v0 = vmul.f32 %v282_v55, %v279_v49  ;;  %v287_v1 = vmul.f32 %v283_v56, %v279_v49 }
 0x1bc   : > { %v297_v63 = vpop.permute.xlu1 %296 }
 0x1bd   : > { %v304_v2 = vmul.f32 %v300_v57, %v297_v63  ;;  %v305_v3 = vmul.f32 %v301_v58, %v297_v63 }
 0x1bf   : > { %v306_v7 = vadd.f32 %v304_v2, %v286_v0  ;;  %v307_v8 = vadd.f32 %v305_v3, %v287_v1 }
 0x1c1   : > { %v324_v11 = vadd.f32 %v322_v5, %v306_v7  ;;  %v325_v12 = vadd.f32 %v323_v6, %v307_v8 }
 0x1c3   : > { %v342_v14 = vadd.f32 %v340_v9, %v324_v11  ;;  %v343_v15 = vadd.f32 %v341_v10, %v325_v12 }
 0x1c5   : > { %v350_v16 = vadd.f32 %v348_v13, %v342_v14  ;;  %v351_v17 = vadd.f32 %v348_v13, %v343_v15 }
 0x1c7   : > { %352 = vst [vmem:[%s217_s8] sm:$0xff] %v350_v16 }
 0x1c8   : > { %353 = vst [vmem:[%s217_s8 + $0x8] sm:$0xff] %v351_v17 }
 0x1c9   : > { %527 = shalt.err (!%p524_p3)
}
 0x1ca   : > { %448 = dma.vmem_to_hbm [thread:$0]  (%p636_p5), %s369_s22, 256, %s371_s9, %s355_s10  }
 0x1cb PF: > { %p454_p4 = scmp.ge.s32.totalorder %s562_s21, 2  ;;  %s382_s23 = sand.u32 1, %s550_s18  }
 0x1cc   : > { %s383_s25 = scalar_lea.sflag [#allocation3], %s382_s23 }
 0x1cd   : > { %p451_p7 = pnand %p454_p4, %p640_p6 }
 0x1cf   : > { %p452_p8 = pneg %p451_p7 }
 0x1d1   : > { %545 = dma.done.wait (%p452_p8), %s383_s25, 256  }
 0x1d2   : > { %547 = vsyncadd (%p452_p8), %s383_s25, 4294967040  ;;  %p15_p9 = scmp.ge.s32.totalorder %s623_s24, 4   ;;  %s714_s18 = smov %s554_s19 }
 0x1d3   : > { %s715_s19 = smov %s558_s20  ;;  %s716_s20 = smov %s634_s27 }
 0x1d4   : > { %s717_s21 = smov %s623_s24  ;;  %17 = sbr.rel (!%p15_p9) target bundleno = 3 (0x3), region = 78 }
 0x1d9   :  { %389 = vsyncpa [#allocation3], 1 }
 0x1da   :  { %391 = vsyncpa [#allocation3 + $0x1], 1 }

</bundles_post_ra>
